<compile_context>
chip_gen: v7x
topology: tpu7x:2x2x1
jax: 0.10.0
libtpu: 0.0.40
codegen_flags: <defaults>
</compile_context>

<pallas_src>
import math
from functools import partial

import numpy as np
import jax
import jax.numpy as jnp
from jax.experimental import pallas as pl
from jax.experimental.pallas import tpu as pltpu


def _round_up(a, b):
    return ((a + b - 1) // b) * b


def _dft_cos_sin_np(n):
    """Real/imag parts of the size-n DFT matrix, built host-side in f64.

    int64 product + mod avoids int32 overflow of k*c for large n."""
    k = np.arange(n, dtype=np.int64)
    prod = (k[:, None] * k[None, :]) % n
    ang = (2.0 * np.pi / n) * prod.astype(np.float64)
    return np.cos(ang), np.sin(ang)


def fnet_kernel(x_ref, w2_ref, ccb_ref, scb_ref, o_ref, acc_ref, *, tn):
    k = pl.program_id(2)

    @pl.when(k == 0)
    def _():
        acc_ref[...] = jnp.zeros_like(acc_ref)

    # Fused sequence-DFT contraction: a single (TM,TK)@(TK,2*TN) MXU matmul
    # per step accumulates both the cos and the sin halves.
    acc_ref[...] += jnp.dot(x_ref[...], w2_ref[...],
                            preferred_element_type=jnp.float32)

    @pl.when(k == pl.num_programs(2) - 1)
    def _():
        acc = acc_ref[...]
        # Epilogue: block-diagonal channel DFT (mixes only within each batch
        # element's group of C rows) and the cos/sin combination.
        out = (jnp.dot(ccb_ref[...], acc[:, :tn],
                       preferred_element_type=jnp.float32)
               - jnp.dot(scb_ref[...], acc[:, tn:],
                         preferred_element_type=jnp.float32))
        o_ref[...] = out.astype(o_ref.dtype)


def fnet_forward(x, *, compute_dtype=jnp.float32):
    """FNet mixing (channel_loc=1) for NCHW input x -> same-shape real output."""
    B, C, H, W = x.shape
    N = H * W
    M = B * C
    out_dtype = x.dtype

    LANE = 128
    N_pad = _round_up(N, LANE)

    # Output / contraction tiles: prefer 256-multiples (fills v6e/v7x MXU),
    # 128 is always a valid fallback (v5e alignment).
    TN = 256 if N_pad % 256 == 0 else 128
    TK = next(t for t in (512, 256, 128) if N_pad % t == 0)

    # Row tile: multiple of C (block-diag channel mix stays inside the tile)
    # and of 8 (f32 sublane).
    Lm = (C * 8) // math.gcd(C, 8)
    TM = min(_round_up(256, Lm), _round_up(M, Lm))
    M_pad = _round_up(M, TM)

    # ---- host-side constants (trace-time, float64) ----------------------
    Cn, Sn = _dft_cos_sin_np(N)          # (N, N)
    Cc, Sc = _dft_cos_sin_np(C)          # (C, C)

    # Pad the sequence-DFT matrices and interleave [Cn | Sn] per TN-tile so a
    # single rectangular (TK, 2*TN) block feeds both accumulator halves.
    Cn_p = np.zeros((N_pad, N_pad), np.float64)
    Sn_p = np.zeros((N_pad, N_pad), np.float64)
    Cn_p[:N, :N] = Cn
    Sn_p[:N, :N] = Sn
    Jb = N_pad // TN
    W2 = np.stack(
        [Cn_p.reshape(N_pad, Jb, TN), Sn_p.reshape(N_pad, Jb, TN)], axis=2
    ).reshape(N_pad, 2 * N_pad)

    # Block-diagonal channel-DFT mixers for one TM-row tile (same for every
    # row tile since the pattern repeats every C rows).
    eye = np.eye(TM // C)
    Ccb = np.kron(eye, Cc)
    Scb = np.kron(eye, Sc)

    x_flat = x.reshape(M, N).astype(compute_dtype)
    if (M_pad, N_pad) != (M, N):
        x_flat = jnp.pad(x_flat, ((0, M_pad - M), (0, N_pad - N)))

    w2 = jnp.asarray(W2, dtype=compute_dtype)
    ccb = jnp.asarray(Ccb, dtype=jnp.float32)   # epilogue stays f32
    scb = jnp.asarray(Scb, dtype=jnp.float32)

    grid = (M_pad // TM, N_pad // TN, N_pad // TK)

    flops = 2 * M_pad * N_pad * 2 * N_pad + 4 * M_pad * TM * N_pad
    bytes_accessed = int(
        x_flat.size * x_flat.dtype.itemsize * (N_pad // TN)    # x re-read per j
        + w2.size * w2.dtype.itemsize * (M_pad // TM)           # w2 re-read per i
        + (ccb.size + scb.size) * 4
        + M_pad * N_pad * jnp.dtype(out_dtype).itemsize)

    # NOTE: ccb/scb/w2 have constant-per-axis index maps so they are not
    # re-DMA'd; single-buffering them (pl.Buffered(1)) would shave a little
    # more VMEM but is left at the default for portability.
    out_flat = pl.pallas_call(
        partial(fnet_kernel, tn=TN),
        out_shape=jax.ShapeDtypeStruct((M_pad, N_pad), out_dtype),
        grid_spec=pltpu.PrefetchScalarGridSpec(
            num_scalar_prefetch=0,
            grid=grid,
            in_specs=[
                pl.BlockSpec((TM, TK), lambda i, j, k: (i, k)),        # x
                pl.BlockSpec((TK, 2 * TN), lambda i, j, k: (k, j)),    # [Cn|Sn]
                pl.BlockSpec((TM, TM), lambda i, j, k: (0, 0)),        # kron(I,Cc)
                pl.BlockSpec((TM, TM), lambda i, j, k: (0, 0)),        # kron(I,Sc)
            ],
            out_specs=pl.BlockSpec((TM, TN), lambda i, j, k: (i, j)),
            scratch_shapes=[pltpu.VMEM((TM, 2 * TN), jnp.float32)],
        ),
        compiler_params=pltpu.CompilerParams(
            dimension_semantics=("parallel", "parallel", "arbitrary"),
            vmem_limit_bytes=48 * 1024 * 1024,
        ),
        cost_estimate=pl.CostEstimate(
            flops=flops, transcendentals=0, bytes_accessed=bytes_accessed),
    )(x_flat, w2, ccb, scb)

    return out_flat[:M, :N].reshape(B, C, H, W)


if __name__ == "__main__":
    key = jax.random.PRNGKey(0)
    B, C, H, W = 2, 4, 16, 16
    x = jax.random.normal(key, (B, C, H, W), dtype=jnp.float32)

    out = fnet_forward(x)
    out = jax.block_until_ready(out)

    # Reference: exact FFT semantics of the PyTorch module (channel_loc=1).
    x_flat = x.reshape(B, C, H * W)
    ref = jnp.fft.fft(jnp.fft.fft(x_flat, axis=1), axis=-1).real.reshape(B, C, H, W)

    assert out.shape == (B, C, H, W)
    err = float(jnp.max(jnp.abs(out - ref)))
    assert jnp.allclose(out, ref.astype(jnp.float32), atol=1e-2, rtol=1e-3), err

    print("KERNEL_OK")
</pallas_src>

<mosaic_0001>
module attributes {stable_mosaic.version = 11 : i64} {
  func.func @fnet_kernel(%arg0: i32, %arg1: i32, %arg2: i32, %arg3: memref<8x256xf32, #tpu.memory_space<vmem>>, %arg4: memref<256x512xf32, #tpu.memory_space<vmem>>, %arg5: memref<8x8xf32, #tpu.memory_space<vmem>>, %arg6: memref<8x8xf32, #tpu.memory_space<vmem>>, %arg7: memref<8x256xf32, #tpu.memory_space<vmem>>, %arg8: memref<8x512xf32, #tpu.memory_space<vmem>>) attributes {dimension_semantics = [#tpu.dimension_semantics<parallel>, #tpu.dimension_semantics<parallel>, #tpu.dimension_semantics<arbitrary>], iteration_bounds = array<i64: 1, 1, 1>, scalar_prefetch = 0 : i64, scratch_operands = 1 : i64, tpu.core_type = #tpu.core_type<tc>, window_params = [{transform_indices = @transform_0, window_bounds = array<i64: 8, 256>}, {transform_indices = @transform_1, window_bounds = array<i64: 256, 512>}, {pipeline_mode = #tpu.pipeline_mode<synchronous>, transform_indices = @transform_2, window_bounds = array<i64: 8, 8>}, {pipeline_mode = #tpu.pipeline_mode<synchronous>, transform_indices = @transform_3, window_bounds = array<i64: 8, 8>}, {transform_indices = @transform_4, window_bounds = array<i64: 8, 256>}]} {
    %c0_i32 = arith.constant 0 : i32
    %0 = arith.cmpi eq, %arg2, %c0_i32 : i32
    %1 = arith.extui %0 : i1 to i32
    %c0_i32_0 = arith.constant 0 : i32
    %2 = arith.cmpi ne, %1, %c0_i32_0 : i32
    scf.if %2 {
      %cst_10 = arith.constant 0.000000e+00 : f32
      %12 = vector.broadcast %cst_10 : f32 to vector<8x512xf32>
      %c0_11 = arith.constant 0 : index
      %c0_12 = arith.constant 0 : index
      %13 = vector.load %arg8[%c0_11, %c0_12] : memref<8x512xf32, #tpu.memory_space<vmem>>, vector<8x512xf32>
      tpu.vector_store %arg8[%c0_11, %c0_12], %12 {strides = array<i32>} : memref<8x512xf32, #tpu.memory_space<vmem>>, vector<8x512xf32>,
    } else {
    }
    %c0 = arith.constant 0 : index
    %c0_1 = arith.constant 0 : index
    %3 = vector.load %arg8[%c0, %c0_1] : memref<8x512xf32, #tpu.memory_space<vmem>>, vector<8x512xf32>
    %c0_2 = arith.constant 0 : index
    %c0_3 = arith.constant 0 : index
    %4 = vector.load %arg3[%c0_2, %c0_3] : memref<8x256xf32, #tpu.memory_space<vmem>>, vector<8x256xf32>
    %c0_4 = arith.constant 0 : index
    %c0_5 = arith.constant 0 : index
    %5 = vector.load %arg4[%c0_4, %c0_5] : memref<256x512xf32, #tpu.memory_space<vmem>>, vector<256x512xf32>
    %cst = arith.constant dense<0.000000e+00> : vector<8x512xf32>
    %6 = tpu.matmul %4, %5, %cst {dimension_numbers = #tpu.dot_dimension_numbers<[1], [0], [0], [1], [0, 0, 1, 1], [], []>} : vector<8x256xf32>, vector<256x512xf32>, vector<8x512xf32> -> vector<8x512xf32>
    %7 = arith.addf %3, %6 : vector<8x512xf32>
    %c0_6 = arith.constant 0 : index
    %c0_7 = arith.constant 0 : index
    %8 = vector.load %arg8[%c0_6, %c0_7] : memref<8x512xf32, #tpu.memory_space<vmem>>, vector<8x512xf32>
    tpu.vector_store %arg8[%c0_6, %c0_7], %7 {strides = array<i32>} : memref<8x512xf32, #tpu.memory_space<vmem>>, vector<8x512xf32>,
    %c0_i32_8 = arith.constant 0 : i32
    %9 = arith.cmpi eq, %arg2, %c0_i32_8 : i32
    %10 = arith.extui %9 : i1 to i32
    %c0_i32_9 = arith.constant 0 : i32
    %11 = arith.cmpi ne, %10, %c0_i32_9 : i32
    scf.if %11 {
      %c0_10 = arith.constant 0 : index
      %c0_11 = arith.constant 0 : index
      %12 = vector.load %arg8[%c0_10, %c0_11] : memref<8x512xf32, #tpu.memory_space<vmem>>, vector<8x512xf32>
      %c0_12 = arith.constant 0 : index
      %c0_13 = arith.constant 0 : index
      %13 = vector.load %arg5[%c0_12, %c0_13] : memref<8x8xf32, #tpu.memory_space<vmem>>, vector<8x8xf32>
      %14 = vector.extract_strided_slice %12 {offsets = [0, 0], sizes = [8, 256], strides = [1, 1]} : vector<8x512xf32> to vector<8x256xf32>
      %cst_14 = arith.constant dense<0.000000e+00> : vector<8x256xf32>
      %15 = tpu.matmul %13, %14, %cst_14 {dimension_numbers = #tpu.dot_dimension_numbers<[1], [0], [0], [1], [0, 0, 1, 1], [], []>} : vector<8x8xf32>, vector<8x256xf32>, vector<8x256xf32> -> vector<8x256xf32>
      %c0_15 = arith.constant 0 : index
      %c0_16 = arith.constant 0 : index
      %16 = vector.load %arg6[%c0_15, %c0_16] : memref<8x8xf32, #tpu.memory_space<vmem>>, vector<8x8xf32>
      %17 = vector.extract_strided_slice %12 {offsets = [0, 256], sizes = [8, 256], strides = [1, 1]} : vector<8x512xf32> to vector<8x256xf32>
      %cst_17 = arith.constant dense<0.000000e+00> : vector<8x256xf32>
      %18 = tpu.matmul %16, %17, %cst_17 {dimension_numbers = #tpu.dot_dimension_numbers<[1], [0], [0], [1], [0, 0, 1, 1], [], []>} : vector<8x8xf32>, vector<8x256xf32>, vector<8x256xf32> -> vector<8x256xf32>
      %19 = arith.subf %15, %18 : vector<8x256xf32>
      %c0_18 = arith.constant 0 : index
      %c0_19 = arith.constant 0 : index
      %20 = vector.load %arg7[%c0_18, %c0_19] : memref<8x256xf32, #tpu.memory_space<vmem>>, vector<8x256xf32>
      tpu.vector_store %arg7[%c0_18, %c0_19], %19 {strides = array<i32>} : memref<8x256xf32, #tpu.memory_space<vmem>>, vector<8x256xf32>,
    } else {
    }
    return
  }
  func.func @transform_0(%arg0: i32, %arg1: i32, %arg2: i32) -> (i32, i32) {
    %c0_i32 = arith.constant 0 : i32
    return %arg0, %arg2 : i32, i32
  }
  func.func @transform_1(%arg0: i32, %arg1: i32, %arg2: i32) -> (i32, i32) {
    %c0_i32 = arith.constant 0 : i32
    return %arg2, %arg1 : i32, i32
  }
  func.func @transform_2(%arg0: i32, %arg1: i32, %arg2: i32) -> (i32, i32) {
    %c0_i32 = arith.constant 0 : i32
    %c0_i32_0 = arith.constant 0 : i32
    %c0_i32_1 = arith.constant 0 : i32
    return %c0_i32, %c0_i32_0 : i32, i32
  }
  func.func @transform_3(%arg0: i32, %arg1: i32, %arg2: i32) -> (i32, i32) {
    %c0_i32 = arith.constant 0 : i32
    %c0_i32_0 = arith.constant 0 : i32
    %c0_i32_1 = arith.constant 0 : i32
    return %c0_i32, %c0_i32_0 : i32, i32
  }
  func.func @transform_4(%arg0: i32, %arg1: i32, %arg2: i32) -> (i32, i32) {
    %c0_i32 = arith.constant 0 : i32
    return %arg0, %arg1 : i32, i32
  }
}

</mosaic_0001>

<bundles_post_ra>
// kernel: tpu_custom_call.1
= control target key start
LH: loop header
LB: loop body
LE: loop exit
PB: predicated region body
PF: predicated region fallthrough
CT: control target
= control target key end

     0   :  { %9 = vsyncpa [#allocation4], 0  ;;  %s839_s0 = inlined_call_operand.hbm [shape: f32[8,256], index: 0, kind: input, shape index: {}]   ;;  %s840_s1 = inlined_call_operand.hbm [shape: f32[256,512], index: 1, kind: input, shape index: {}]   ;;  %s841_s2 = inlined_call_operand.hbm [shape: f32[8,8], index: 2, kind: input, shape index: {}]   ;;  %s842_s3 = inlined_call_operand.vmem [shape: f32[8,8], index: 3, kind: input, shape index: {}]   ;;  %s843_s4 = inlined_call_operand.hbm [shape: f32[8,256], index: 4, kind: output, shape index: {}]  }
   0x1   :  { %10 = vsyncpa [#allocation7], 0 }
   0x2   :  { %11 = vsyncpa [#allocation5], 0  ;;  %s756_s15 = smov [#allocation6]   ;;  %s662_s19 = scalar_lea.hbm %s840_s1, 16384 }
   0x3   :  { %s27_s16 = sshll.u32 %s756_s15, 4  ;;  %p663_p0 = scmp.ne.s32.totalorder %s840_s1, %s662_s19  ;;  %s28_s16 = int_to_ptr.vmem [resolvable:$true] %s27_s16 }
   0x4   :  { %p666_p1 = scmp.lt.u32.totalorder %s662_s19, %s840_s1 }
   0x6   :  { %p668_p2 = pnand %p666_p1, %p663_p0 }
   0x8   :  { %671 = shalt.err (!%p668_p2)
}
   0x9   :  { %s672_s24 = scalar_lea.vmem %s28_s16, 16384  ;;  %p677_p4 = scmp.lt.s32.totalorder %s28_s16, %s28_s16 }
   0xa   :  { %p673_p3 = scmp.ne.s32.totalorder %s28_s16, %s672_s24  ;;  %p678_p5 = scmp.lt.s32.totalorder %s672_s24, %s672_s24 }
   0xc   :  { %p679_p6 = por %p678_p5, %p677_p4 }
   0xe   :  { %p680_p7 = pnand %p679_p6, %p673_p3 }
  0x10   :  { %683 = shalt.err (!%p680_p7)
}
  0x11   :  { %s757_s25 = smov 512   ;;  %s758_s26 = smov 32  }
  0x12   :  { %33 = dma.hbm_to_vmem [thread:$0]  %s840_s1, 16384, %s28_s16, [#allocation7], %s757_s25, %s757_s25, %s758_s26  }
  0x13   :  { %s759_s29 = smov [#allocation3]   ;;  %s760_s5 = smov [#allocation8]  }
  0x14   :  { %s18_s30 = sshll.u32 %s759_s29, 4  ;;  %s40_s6 = sshll.u32 %s760_s5, 4  ;;  %s19_s30 = int_to_ptr.vmem [resolvable:$true] %s18_s30  ;;  %s41_s6 = int_to_ptr.vmem [resolvable:$true] %s40_s6 }
  0x15   :  { %s684_s9 = scalar_lea.hbm %s839_s0, 256 }
  0x16   :  { %p685_p8 = scmp.ne.s32.totalorder %s839_s0, %s684_s9  ;;  %p688_p9 = scmp.lt.u32.totalorder %s684_s9, %s839_s0 }
  0x18   :  { %p690_p10 = pnand %p688_p9, %p685_p8 }
  0x1a   :  { %693 = shalt.err (!%p690_p10)
}
  0x1b   :  { %s694_s1 = scalar_lea.vmem %s19_s30, 256  ;;  %p699_p12 = scmp.lt.s32.totalorder %s19_s30, %s19_s30 }
  0x1c   :  { %p695_p11 = scmp.ne.s32.totalorder %s19_s30, %s694_s1  ;;  %p700_p13 = scmp.lt.s32.totalorder %s694_s1, %s694_s1 }
  0x1e   :  { %p701_p0 = por %p700_p13, %p699_p12 }
  0x20   :  { %p702_p1 = pnand %p701_p0, %p695_p11 }
  0x22   :  { %705 = shalt.err (!%p702_p1)
}
  0x23   :  { %21 = dma.hbm_to_vmem [thread:$0]  %s839_s0, 256, %s19_s30, [#allocation4]  }
  0x24   :  { %s706_s18 = scalar_lea.hbm %s841_s2, 128 }
  0x25   :  { %p707_p2 = scmp.ne.s32.totalorder %s841_s2, %s706_s18  ;;  %p710_p3 = scmp.lt.u32.totalorder %s706_s18, %s841_s2 }
  0x27   :  { %p712_p4 = pnand %p710_p3, %p707_p2 }
  0x29   :  { %715 = shalt.err (!%p712_p4)
}
  0x2a   :  { %s716_s23 = scalar_lea.vmem %s41_s6, 128  ;;  %p721_p6 = scmp.lt.s32.totalorder %s41_s6, %s41_s6 }
  0x2b   :  { %p717_p5 = scmp.ne.s32.totalorder %s41_s6, %s716_s23  ;;  %p722_p7 = scmp.lt.s32.totalorder %s716_s23, %s716_s23 }
  0x2d   :  { %p723_p8 = por %p722_p7, %p721_p6 }
  0x2f   :  { %p724_p9 = pnand %p723_p8, %p717_p5 }
  0x31   :  { %727 = shalt.err (!%p724_p9)
}
  0x32   :  { %43 = dma.hbm_to_vmem [thread:$0]  %s841_s2, 128, %s41_s6, [#allocation7]  }
  0x33   :  { %750 = dma.done.wait [#allocation4], 256  }
  0x34   :  { %751 = vsyncadd [#allocation4], 4294967040 }
  0x35   :  { %752 = dma.done.wait [#allocation7], 16512  }
  0x36   :  { %753 = vsyncadd [#allocation7], 4294950784  ;;  %v70_v0 = vld [vmem:[#allocation6 + $0x8] sm:$0xff]  ;;  %v72_v2 = vld [vmem:[#allocation6 + $0x18] sm:$0xff]  ;;  %vm355_vm0 = vcmask 64512   ;;  %s762_s26 = smov [#allocation9]  }
  0x37   :  { %v74_v1 = vld [vmem:[#allocation6 + $0x28] sm:$0xff]  ;;  %v76_v4 = vld [vmem:[#allocation6 + $0x38] sm:$0xff]  ;;  %v69_v5 = vld [vmem:[#allocation6] sm:$0xff]  ;;  %s515_s27 = sshll.u32 %s762_s26, 4  ;;  %s516_s27 = int_to_ptr.vmem [resolvable:$true] %s515_s27 }
  0x38   :  { %v527_v3 = vpack.c.bf16 %v74_v1, %v70_v0  ;;  %v73_v6 = vld [vmem:[#allocation6 + $0x20] sm:$0xff]  ;;  %v591_v7 = vpack.c.bf16 %v76_v4, %v72_v2  ;;  %v71_v9 = vld [vmem:[#allocation6 + $0x10] sm:$0xff]  ;;  %v78_v11 = vld [vmem:[#allocation6 + $0x48] sm:$0xff]  ;;  %s728_s28 = scalar_lea.vmem %s516_s27, 256  ;;  %p733_p11 = scmp.lt.s32.totalorder %s516_s27, %s516_s27 }
  0x39   :  { %v529_v8 = vpack.c.bf16 %v73_v6, %v69_v5  ;;  %v75_v10 = vld [vmem:[#allocation6 + $0x30] sm:$0xff]  ;;  %v82_v13 = vld [vmem:[#allocation6 + $0x68] sm:$0xff]  ;;  %v80_v14 = vld [vmem:[#allocation6 + $0x58] sm:$0xff]  ;;  %p729_p10 = scmp.ne.s32.totalorder %s516_s27, %s728_s28  ;;  %p734_p12 = scmp.lt.s32.totalorder %s728_s28, %s728_s28 }
  0x3a   :  { %528 = vmatprep.subr.bf16.mxu0 %v527_v3  ;;  %v593_v12 = vpack.c.bf16 %v75_v10, %v71_v9  ;;  %v84_v15 = vld [vmem:[#allocation6 + $0x78] sm:$0xff]  ;;  %592 = vmatprep.subr.bf16.mxu1 %v591_v7  ;;  %v531_v16 = vpack.c.bf16 %v82_v13, %v78_v11  ;;  %v77_v18 = vld [vmem:[#allocation6 + $0x40] sm:$0xff]  ;;  %v79_v20 = vld [vmem:[#allocation6 + $0x50] sm:$0xff] }
  0x3b   :  { %530 = vmatpush1.bf16.msra.mxu0 %v529_v8  ;;  %v595_v17 = vpack.c.bf16 %v84_v15, %v80_v14  ;;  %v81_v19 = vld [vmem:[#allocation6 + $0x60] sm:$0xff]  ;;  %v83_v22 = vld [vmem:[#allocation6 + $0x70] sm:$0xff]  ;;  %v86_v23 = vld [vmem:[#allocation6 + $0x88] sm:$0xff]  ;;  %p735_p13 = por %p734_p12, %p733_p11 }
  0x3c   :  { %594 = vmatpush1.bf16.msra.mxu1 %v593_v12  ;;  %v533_v21 = vpack.c.bf16 %v81_v19, %v77_v18  ;;  %v90_v24 = vld [vmem:[#allocation6 + $0xa8] sm:$0xff]  ;;  %532 = vmatprep.subr.bf16.mxu0 %v531_v16  ;;  %v597_v25 = vpack.c.bf16 %v83_v22, %v79_v20  ;;  %v88_v27 = vld [vmem:[#allocation6 + $0x98] sm:$0xff]  ;;  %v85_v29 = vld [vmem:[#allocation6 + $0x80] sm:$0xff] }
  0x3d   :  { %596 = vmatprep.subr.bf16.mxu1 %v595_v17  ;;  %v535_v26 = vpack.c.bf16 %v90_v24, %v86_v23  ;;  %v92_v28 = vld [vmem:[#allocation6 + $0xb8] sm:$0xff]  ;;  %v89_v31 = vld [vmem:[#allocation6 + $0xa0] sm:$0xff]  ;;  %v87_v32 = vld [vmem:[#allocation6 + $0x90] sm:$0xff]  ;;  %p736_p0 = pnand %p735_p13, %p729_p10 }
  0x3e   :  { %v599_v30 = vpack.c.bf16 %v92_v28, %v88_v27  ;;  %v91_v33 = vld [vmem:[#allocation6 + $0xb0] sm:$0xff]  ;;  %v537_v34 = vpack.c.bf16 %v89_v31, %v85_v29  ;;  %v94_v35 = vld [vmem:[#allocation6 + $0xc8] sm:$0xff]  ;;  %v96_v37 = vld [vmem:[#allocation6 + $0xd8] sm:$0xff] }
  0x3f   :  { %534 = vmatpush1.bf16.msra.mxu0 %v533_v21  ;;  %v98_v36 = vld [vmem:[#allocation6 + $0xe8] sm:$0xff]  ;;  %v601_v38 = vpack.c.bf16 %v91_v33, %v87_v32  ;;  %v100_v40 = vld [vmem:[#allocation6 + $0xf8] sm:$0xff]  ;;  %v93_v41 = vld [vmem:[#allocation6 + $0xc0] sm:$0xff] }
  0x40   :  { %598 = vmatpush1.bf16.msra.mxu1 %v597_v25  ;;  %536 = vmatprep.subr.bf16.mxu0 %v535_v26  ;;  %v539_v39 = vpack.c.bf16 %v98_v36, %v94_v35  ;;  %v97_v42 = vld [vmem:[#allocation6 + $0xe0] sm:$0xff]  ;;  %v603_v43 = vpack.c.bf16 %v100_v40, %v96_v37  ;;  %v95_v44 = vld [vmem:[#allocation6 + $0xd0] sm:$0xff]  ;;  %v102_v46 = vld [vmem:[#allocation6 + $0x108] sm:$0xff] }
  0x41   :  { %600 = vmatprep.subr.bf16.mxu1 %v599_v30  ;;  %v99_v45 = vld [vmem:[#allocation6 + $0xf0] sm:$0xff]  ;;  %v106_v47 = vld [vmem:[#allocation6 + $0x128] sm:$0xff]  ;;  %v104_v48 = vld [vmem:[#allocation6 + $0x118] sm:$0xff]  ;;  %v541_v50 = vpack.c.bf16 %v97_v42, %v93_v41 }
  0x42   :  { %v108_v49 = vld [vmem:[#allocation6 + $0x138] sm:$0xff]  ;;  %v605_v51 = vpack.c.bf16 %v99_v45, %v95_v44  ;;  %v543_v52 = vpack.c.bf16 %v106_v47, %v102_v46  ;;  %v101_v53 = vld [vmem:[#allocation6 + $0x100] sm:$0xff]  ;;  %v103_v55 = vld [vmem:[#allocation6 + $0x110] sm:$0xff] }
  0x43   :  { %538 = vmatpush1.bf16.msra.mxu0 %v537_v34  ;;  %v105_v54 = vld [vmem:[#allocation6 + $0x120] sm:$0xff]  ;;  %v607_v56 = vpack.c.bf16 %v108_v49, %v104_v48  ;;  %v107_v57 = vld [vmem:[#allocation6 + $0x130] sm:$0xff]  ;;  %v110_v58 = vld [vmem:[#allocation6 + $0x148] sm:$0xff] }
  0x44   :  { %602 = vmatpush1.bf16.msra.mxu1 %v601_v38  ;;  %540 = vmatprep.subr.bf16.mxu0 %v539_v39  ;;  %v114_v59 = vld [vmem:[#allocation6 + $0x168] sm:$0xff]  ;;  %v112_v60 = vld [vmem:[#allocation6 + $0x158] sm:$0xff]  ;;  %v545_v62 = vpack.c.bf16 %v105_v54, %v101_v53  ;;  %v609_v63 = vpack.c.bf16 %v107_v57, %v103_v55  ;;  %v109_v1 = vld [vmem:[#allocation6 + $0x140] sm:$0xff] }
  0x45   :  { %604 = vmatprep.subr.bf16.mxu1 %v603_v43  ;;  %v116_v61 = vld [vmem:[#allocation6 + $0x178] sm:$0xff]  ;;  %v547_v0 = vpack.c.bf16 %v114_v59, %v110_v58  ;;  %v113_v2 = vld [vmem:[#allocation6 + $0x160] sm:$0xff]  ;;  %v111_v3 = vld [vmem:[#allocation6 + $0x150] sm:$0xff] }
  0x46   :  { %v611_v4 = vpack.c.bf16 %v116_v61, %v112_v60  ;;  %v115_v5 = vld [vmem:[#allocation6 + $0x170] sm:$0xff]  ;;  %v118_v6 = vld [vmem:[#allocation6 + $0x188] sm:$0xff]  ;;  %v120_v8 = vld [vmem:[#allocation6 + $0x198] sm:$0xff]  ;;  %v549_v10 = vpack.c.bf16 %v113_v2, %v109_v1 }
  0x47   :  { %542 = vmatpush1.bf16.msra.mxu0 %v541_v50  ;;  %v122_v7 = vld [vmem:[#allocation6 + $0x1a8] sm:$0xff]  ;;  %v124_v9 = vld [vmem:[#allocation6 + $0x1b8] sm:$0xff]  ;;  %v613_v11 = vpack.c.bf16 %v115_v5, %v111_v3  ;;  %v117_v13 = vld [vmem:[#allocation6 + $0x180] sm:$0xff] }
  0x48   :  { %606 = vmatpush1.bf16.msra.mxu1 %v605_v51  ;;  %544 = vmatprep.subr.bf16.mxu0 %v543_v52  ;;  %v551_v12 = vpack.c.bf16 %v122_v7, %v118_v6  ;;  %v121_v14 = vld [vmem:[#allocation6 + $0x1a0] sm:$0xff]  ;;  %v119_v15 = vld [vmem:[#allocation6 + $0x190] sm:$0xff]  ;;  %v615_v16 = vpack.c.bf16 %v124_v9, %v120_v8  ;;  %v126_v18 = vld [vmem:[#allocation6 + $0x1c8] sm:$0xff] }
  0x49   :  { %608 = vmatprep.subr.bf16.mxu1 %v607_v56  ;;  %v123_v17 = vld [vmem:[#allocation6 + $0x1b0] sm:$0xff]  ;;  %v130_v19 = vld [vmem:[#allocation6 + $0x1e8] sm:$0xff]  ;;  %v128_v20 = vld [vmem:[#allocation6 + $0x1d8] sm:$0xff]  ;;  %v553_v22 = vpack.c.bf16 %v121_v14, %v117_v13 }
  0x4a   :  { %v132_v21 = vld [vmem:[#allocation6 + $0x1f8] sm:$0xff]  ;;  %v617_v23 = vpack.c.bf16 %v123_v17, %v119_v15  ;;  %v555_v24 = vpack.c.bf16 %v130_v19, %v126_v18  ;;  %v125_v25 = vld [vmem:[#allocation6 + $0x1c0] sm:$0xff]  ;;  %v127_v27 = vld [vmem:[#allocation6 + $0x1d0] sm:$0xff] }
  0x4b   :  { %546 = vmatpush1.bf16.msra.mxu0 %v545_v62  ;;  %v129_v26 = vld [vmem:[#allocation6 + $0x1e0] sm:$0xff]  ;;  %v619_v28 = vpack.c.bf16 %v132_v21, %v128_v20  ;;  %v131_v29 = vld [vmem:[#allocation6 + $0x1f0] sm:$0xff]  ;;  %v134_v30 = vld [vmem:[#allocation6 + $0x208] sm:$0xff] }
  0x4c   :  { %610 = vmatpush1.bf16.msra.mxu1 %v609_v63  ;;  %548 = vmatprep.subr.bf16.mxu0 %v547_v0  ;;  %v138_v31 = vld [vmem:[#allocation6 + $0x228] sm:$0xff]  ;;  %v136_v32 = vld [vmem:[#allocation6 + $0x218] sm:$0xff]  ;;  %v557_v34 = vpack.c.bf16 %v129_v26, %v125_v25  ;;  %v621_v35 = vpack.c.bf16 %v131_v29, %v127_v27  ;;  %v133_v37 = vld [vmem:[#allocation6 + $0x200] sm:$0xff] }
  0x4d   :  { %612 = vmatprep.subr.bf16.mxu1 %v611_v4  ;;  %v140_v33 = vld [vmem:[#allocation6 + $0x238] sm:$0xff]  ;;  %v559_v36 = vpack.c.bf16 %v138_v31, %v134_v30  ;;  %v137_v38 = vld [vmem:[#allocation6 + $0x220] sm:$0xff]  ;;  %v135_v39 = vld [vmem:[#allocation6 + $0x210] sm:$0xff] }
  0x4e   :  { %v623_v40 = vpack.c.bf16 %v140_v33, %v136_v32  ;;  %v139_v41 = vld [vmem:[#allocation6 + $0x230] sm:$0xff]  ;;  %v142_v42 = vld [vmem:[#allocation6 + $0x248] sm:$0xff]  ;;  %v144_v44 = vld [vmem:[#allocation6 + $0x258] sm:$0xff]  ;;  %v561_v46 = vpack.c.bf16 %v137_v38, %v133_v37 }
  0x4f   :  { %550 = vmatpush1.bf16.msra.mxu0 %v549_v10  ;;  %v146_v43 = vld [vmem:[#allocation6 + $0x268] sm:$0xff]  ;;  %v148_v45 = vld [vmem:[#allocation6 + $0x278] sm:$0xff]  ;;  %v625_v47 = vpack.c.bf16 %v139_v41, %v135_v39  ;;  %v141_v49 = vld [vmem:[#allocation6 + $0x240] sm:$0xff] }
  0x50   :  { %614 = vmatpush1.bf16.msra.mxu1 %v613_v11  ;;  %552 = vmatprep.subr.bf16.mxu0 %v551_v12  ;;  %v563_v48 = vpack.c.bf16 %v146_v43, %v142_v42  ;;  %v145_v50 = vld [vmem:[#allocation6 + $0x260] sm:$0xff]  ;;  %v143_v51 = vld [vmem:[#allocation6 + $0x250] sm:$0xff]  ;;  %v627_v52 = vpack.c.bf16 %v148_v45, %v144_v44  ;;  %v150_v54 = vld [vmem:[#allocation6 + $0x288] sm:$0xff] }
  0x51   :  { %616 = vmatprep.subr.bf16.mxu1 %v615_v16  ;;  %v147_v53 = vld [vmem:[#allocation6 + $0x270] sm:$0xff]  ;;  %v154_v55 = vld [vmem:[#allocation6 + $0x2a8] sm:$0xff]  ;;  %v152_v56 = vld [vmem:[#allocation6 + $0x298] sm:$0xff]  ;;  %v565_v58 = vpack.c.bf16 %v145_v50, %v141_v49 }
  0x52   :  { %v156_v57 = vld [vmem:[#allocation6 + $0x2b8] sm:$0xff]  ;;  %v629_v59 = vpack.c.bf16 %v147_v53, %v143_v51  ;;  %v567_v60 = vpack.c.bf16 %v154_v55, %v150_v54  ;;  %v149_v61 = vld [vmem:[#allocation6 + $0x280] sm:$0xff]  ;;  %v151_v63 = vld [vmem:[#allocation6 + $0x290] sm:$0xff] }
  0x53   :  { %554 = vmatpush1.bf16.msra.mxu0 %v553_v22  ;;  %v153_v62 = vld [vmem:[#allocation6 + $0x2a0] sm:$0xff]  ;;  %v631_v0 = vpack.c.bf16 %v156_v57, %v152_v56  ;;  %v155_v1 = vld [vmem:[#allocation6 + $0x2b0] sm:$0xff]  ;;  %v158_v2 = vld [vmem:[#allocation6 + $0x2c8] sm:$0xff] }
  0x54   :  { %618 = vmatpush1.bf16.msra.mxu1 %v617_v23  ;;  %556 = vmatprep.subr.bf16.mxu0 %v555_v24  ;;  %v162_v3 = vld [vmem:[#allocation6 + $0x2e8] sm:$0xff]  ;;  %v160_v4 = vld [vmem:[#allocation6 + $0x2d8] sm:$0xff]  ;;  %v569_v6 = vpack.c.bf16 %v153_v62, %v149_v61  ;;  %v157_v7 = vld [vmem:[#allocation6 + $0x2c0] sm:$0xff]  ;;  %v633_v8 = vpack.c.bf16 %v155_v1, %v151_v63 }
  0x55   :  { %620 = vmatprep.subr.bf16.mxu1 %v619_v28  ;;  %v164_v5 = vld [vmem:[#allocation6 + $0x2f8] sm:$0xff]  ;;  %v571_v9 = vpack.c.bf16 %v162_v3, %v158_v2  ;;  %v161_v10 = vld [vmem:[#allocation6 + $0x2e0] sm:$0xff]  ;;  %v159_v11 = vld [vmem:[#allocation6 + $0x2d0] sm:$0xff]  ;;  %v761_v2 = vmov 0.0  }
  0x56   :  { %v163_v12 = vld [vmem:[#allocation6 + $0x2f0] sm:$0xff]  ;;  %v635_v13 = vpack.c.bf16 %v164_v5, %v160_v4  ;;  %v166_v14 = vld [vmem:[#allocation6 + $0x308] sm:$0xff]  ;;  %v68_v16 = vld [vmem:[#allocation3 + $0x8] sm:$0xff]  ;;  %v573_v19 = vpack.c.bf16 %v161_v10, %v157_v7 }
  0x57   :  { %558 = vmatpush1.bf16.msra.mxu0 %v557_v34  ;;  %v170_v15 = vld [vmem:[#allocation6 + $0x328] sm:$0xff]  ;;  %v168_v17 = vld [vmem:[#allocation6 + $0x318] sm:$0xff]  ;;  %261 = vmatprep.mubr.f32.mxu0 %v68_v16  ;;  %v637_v20 = vpack.c.bf16 %v163_v12, %v159_v11  ;;  %v165_v22 = vld [vmem:[#allocation6 + $0x300] sm:$0xff] }
  0x58   :  { %622 = vmatpush1.bf16.msra.mxu1 %v621_v35  ;;  %560 = vmatprep.subr.bf16.mxu0 %v559_v36  ;;  %v172_v18 = vld [vmem:[#allocation6 + $0x338] sm:$0xff]  ;;  %v575_v21 = vpack.c.bf16 %v170_v15, %v166_v14  ;;  %v169_v23 = vld [vmem:[#allocation6 + $0x320] sm:$0xff]  ;;  %v167_v24 = vld [vmem:[#allocation6 + $0x310] sm:$0xff] }
  0x59   :  { %624 = vmatprep.subr.bf16.mxu1 %v623_v40  ;;  %332 = vmatprep.mubr.f32.mxu1 %v68_v16  ;;  %v639_v25 = vpack.c.bf16 %v172_v18, %v168_v17  ;;  %v171_v26 = vld [vmem:[#allocation6 + $0x330] sm:$0xff]  ;;  %v174_v27 = vld [vmem:[#allocation6 + $0x348] sm:$0xff]  ;;  %v176_v29 = vld [vmem:[#allocation6 + $0x358] sm:$0xff]  ;;  %v577_v31 = vpack.c.bf16 %v169_v23, %v165_v22 }
  0x5a   :  { %v178_v28 = vld [vmem:[#allocation6 + $0x368] sm:$0xff]  ;;  %v180_v30 = vld [vmem:[#allocation6 + $0x378] sm:$0xff]  ;;  %v641_v32 = vpack.c.bf16 %v171_v26, %v167_v24  ;;  %v173_v34 = vld [vmem:[#allocation6 + $0x340] sm:$0xff] }
  0x5b   :  { %562 = vmatpush1.bf16.msra.mxu0 %v561_v46  ;;  %v579_v33 = vpack.c.bf16 %v178_v28, %v174_v27  ;;  %v177_v35 = vld [vmem:[#allocation6 + $0x360] sm:$0xff]  ;;  %v175_v36 = vld [vmem:[#allocation6 + $0x350] sm:$0xff]  ;;  %v643_v37 = vpack.c.bf16 %v180_v30, %v176_v29  ;;  %v182_v39 = vld [vmem:[#allocation6 + $0x388] sm:$0xff] }
  0x5c   :  { %626 = vmatpush1.bf16.msra.mxu1 %v625_v47  ;;  %564 = vmatprep.subr.bf16.mxu0 %v563_v48  ;;  %v179_v38 = vld [vmem:[#allocation6 + $0x370] sm:$0xff]  ;;  %v186_v40 = vld [vmem:[#allocation6 + $0x3a8] sm:$0xff]  ;;  %v184_v41 = vld [vmem:[#allocation6 + $0x398] sm:$0xff]  ;;  %v581_v43 = vpack.c.bf16 %v177_v35, %v173_v34 }
  0x5d   :  { %628 = vmatprep.subr.bf16.mxu1 %v627_v52  ;;  %v188_v42 = vld [vmem:[#allocation6 + $0x3b8] sm:$0xff]  ;;  %v645_v44 = vpack.c.bf16 %v179_v38, %v175_v36  ;;  %v583_v45 = vpack.c.bf16 %v186_v40, %v182_v39  ;;  %v181_v46 = vld [vmem:[#allocation6 + $0x380] sm:$0xff]  ;;  %v183_v48 = vld [vmem:[#allocation6 + $0x390] sm:$0xff] }
  0x5e   :  { %v185_v47 = vld [vmem:[#allocation6 + $0x3a0] sm:$0xff]  ;;  %v647_v49 = vpack.c.bf16 %v188_v42, %v184_v41  ;;  %v187_v50 = vld [vmem:[#allocation6 + $0x3b0] sm:$0xff]  ;;  %v190_v51 = vld [vmem:[#allocation6 + $0x3c8] sm:$0xff] }
  0x5f   :  { %566 = vmatpush1.bf16.msra.mxu0 %v565_v58  ;;  %v194_v52 = vld [vmem:[#allocation6 + $0x3e8] sm:$0xff]  ;;  %v192_v53 = vld [vmem:[#allocation6 + $0x3d8] sm:$0xff]  ;;  %v585_v55 = vpack.c.bf16 %v185_v47, %v181_v46  ;;  %v649_v56 = vpack.c.bf16 %v187_v50, %v183_v48  ;;  %v189_v58 = vld [vmem:[#allocation6 + $0x3c0] sm:$0xff] }
  0x60   :  { %630 = vmatpush1.bf16.msra.mxu1 %v629_v59  ;;  %568 = vmatprep.subr.bf16.mxu0 %v567_v60  ;;  %v196_v54 = vld [vmem:[#allocation6 + $0x3f8] sm:$0xff]  ;;  %v587_v57 = vpack.c.bf16 %v194_v52, %v190_v51  ;;  %v193_v59 = vld [vmem:[#allocation6 + $0x3e0] sm:$0xff]  ;;  %v191_v61 = vld [vmem:[#allocation6 + $0x3d0] sm:$0xff] }
  0x61   :  { %632 = vmatprep.subr.bf16.mxu1 %v631_v0  ;;  %v651_v60 = vpack.c.bf16 %v196_v54, %v192_v53  ;;  %v195_v62 = vld [vmem:[#allocation6 + $0x3f0] sm:$0xff]  ;;  %v589_v63 = vpack.c.bf16 %v193_v59, %v189_v58 }
  0x62   :  { %v653_v0 = vpack.c.bf16 %v195_v62, %v191_v61  ;;  %v67_v1 = vld [vmem:[#allocation3] sm:$0xff] }
  0x63   :  { %570 = vmatpush1.bf16.msra.mxu0 %v569_v6  ;;  %v354_v6 = vld [vmem:[#allocation8] sm:$0xff] }
  0x64   :  { %634 = vmatpush1.bf16.msra.mxu1 %v633_v8  ;;  %572 = vmatprep.subr.bf16.mxu0 %v571_v9  ;;  %v430_v8 = vld [vmem:[%s842_s3] sm:$0xff] }
  0x65   :  { %636 = vmatprep.subr.bf16.mxu1 %v635_v13 }
  0x67   :  { %574 = vmatpush1.bf16.msra.mxu0 %v573_v19 }
  0x68   :  { %638 = vmatpush1.bf16.msra.mxu1 %v637_v20  ;;  %576 = vmatprep.subr.bf16.mxu0 %v575_v21 }
  0x69   :  { %640 = vmatprep.subr.bf16.mxu1 %v639_v25 }
  0x6b   :  { %578 = vmatpush1.bf16.msra.mxu0 %v577_v31 }
  0x6c   :  { %642 = vmatpush1.bf16.msra.mxu1 %v641_v32  ;;  %580 = vmatprep.subr.bf16.mxu0 %v579_v33 }
  0x6d   :  { %644 = vmatprep.subr.bf16.mxu1 %v643_v37 }
  0x6f   :  { %582 = vmatpush1.bf16.msra.mxu0 %v581_v43 }
  0x70   :  { %646 = vmatpush1.bf16.msra.mxu1 %v645_v44  ;;  %584 = vmatprep.subr.bf16.mxu0 %v583_v45 }
  0x71   :  { %648 = vmatprep.subr.bf16.mxu1 %v647_v49 }
  0x73   :  { %586 = vmatpush1.bf16.msra.mxu0 %v585_v55 }
  0x74   :  { %650 = vmatpush1.bf16.msra.mxu1 %v649_v56  ;;  %588 = vmatprep.subr.bf16.mxu0 %v587_v57 }
  0x75   :  { %652 = vmatprep.subr.bf16.mxu1 %v651_v60 }
  0x77   :  { %590 = vmatpush1.bf16.msra.mxu0 %v589_v63 }
  0x78   :  { %654 = vmatpush1.bf16.msra.mxu1 %v653_v0 }
  0x7a   :  { %262 = vmatmul.mubr.f32.vlgmr.msra.gmra.mrb[0].mxu0 %v67_v1 }
  0x7b   :  { %333 = vmatmul.mubr.f32.vlgmr.msra.gmra.mrb[0].mxu1 %v67_v1  ;;  %423 = vmatprep.mubr.f32.mxu0 %v761_v2 }
  0x7c   :  { %498 = vmatprep.mubr.f32.mxu1 %v761_v2 }
 0x14d   :  { %v263_v3 = vpop.f32.mrb[0].mxu0 }
 0x14e   :  { %v334_v4 = vpop.f32.mrb[0].mxu1  ;;  %v265_v5 = vpop.f32.mrb[1].mxu0 }
 0x14f   :  { %v336_v7 = vpop.f32.mrb[1].mxu1  ;;  %359 = vmatprep.subr.mxu0 %v265_v5 }
 0x150   :  { %434 = vmatprep.subr.mxu1 %v336_v7  ;;  %360 = vmatpush1.msra.mxu0 %v263_v3 }
 0x151   :  { %435 = vmatpush1.msra.mxu1 %v334_v4  ;;  %525 = vmatmul.mubr.msk.f32.vlgmr.msra.gmra.mrb[2].mxu0 %vm355_vm0, %v354_v6 }
 0x152   :  { %526 = vmatmul.mubr.msk.f32.vlgmr.msra.gmra.mrb[2].mxu1 %vm355_vm0, %v430_v8 }
 0x224   :  { %v425_v9 = vpop.f32.mrb[2].mxu0 }
 0x225   :  { %v500_v10 = vpop.f32.mrb[2].mxu1  ;;  %v427_v11 = vpop.f32.mrb[3].mxu0 }
 0x226   :  { %v505_v12 = vsub.f32 %v425_v9, %v500_v10  ;;  %v502_v13 = vpop.f32.mrb[3].mxu1 }
 0x227   :  { %v506_v14 = vsub.f32 %v427_v11, %v502_v13 }
 0x228   :  { %507 = vst [vmem:[#allocation9] sm:$0xff] %v505_v12 }
 0x229   :  { %508 = vst [vmem:[#allocation9 + $0x8] sm:$0xff] %v506_v14 }
 0x22a   :  { %739 = shalt.err (!%p736_p0)
}
 0x22b   :  { %s740_s30 = scalar_lea.hbm %s843_s4, 256 }
 0x22c   :  { %p741_p1 = scmp.ne.s32.totalorder %s843_s4, %s740_s30  ;;  %p744_p2 = scmp.lt.u32.totalorder %s740_s30, %s843_s4 }
 0x22e   :  { %p746_p3 = pnand %p744_p2, %p741_p1 }
 0x230   :  { %749 = shalt.err (!%p746_p3)
}
 0x231   :  { %518 = dma.vmem_to_hbm [thread:$0]  %s516_s27, 256, %s843_s4, [#allocation5]  }
 0x232   :  { %754 = dma.done.wait [#allocation5], 256  }
 0x233   :  { %755 = vsyncadd [#allocation5], 4294967040 }
 0x234   :  { %522 = vsyncpa [#allocation4], 1 }
 0x235   :  { %523 = vsyncpa [#allocation7], 1 }
 0x236   :  { %524 = vsyncpa [#allocation5], 1 }

</bundles_post_ra>
